<compile_context>
chip_gen: v7x
topology: tpu7x:2x2x1
jax: 0.10.0
libtpu: 0.0.40
codegen_flags: <defaults>
</compile_context>

<pallas_src>
import jax
import jax.numpy as jnp
from jax.experimental import pallas as pl
from jax.experimental.pallas import tpu as pltpu

_LANE = 128
_SUB = 8


def _fuzzify_kernel(params_ref, x_ref, o_ref):
    # params_ref: SMEM (2, n_mfs) f32 — row 0: mu_j, row 1: -0.5 / sigma_j^2
    # x_ref:      VMEM (rows, 128) f32 — case block, full (8,128) vregs
    # o_ref:      VMEM (n_mfs, rows, 128) out_dtype — transposed output block
    x = x_ref[...]
    n_mfs = o_ref.shape[0]
    for j in range(n_mfs):                      # static unroll; n_mfs is small
        d = x - params_ref[0, j]                # SMEM scalar broadcast (VPU)
        # exp over a full-sublane block -> 8/8 EUP vreg occupancy.
        o_ref[j] = jnp.exp((d * d) * params_ref[1, j]).astype(o_ref.dtype)


def _fuzzify_pallas_transposed(x_flat, mu, scale, out_dtype, target_block_bytes):
    """Run the Pallas kernel. Returns (y_t, n_pad): y_t is (n_mfs, n_pad),
    lane-dense transposed membership values; columns >= n_cases are dead."""
    n_cases = x_flat.shape[0]
    n_mfs = mu.shape[0]

    # Pad cases only to a whole (8,128) vreg tile (<= 1023 dead cases), not to
    # a full multi-MiB block.  Keeps every block fully (8,128)-aligned.
    n_pad = pl.cdiv(n_cases, _SUB * _LANE) * (_SUB * _LANE)
    if n_pad != n_cases:
        x_flat = jnp.pad(x_flat, (0, n_pad - n_cases))
    rows_total = n_pad // _LANE                       # multiple of 8
    x2 = x_flat.reshape(rows_total, _LANE)

    out_bytes = jnp.dtype(out_dtype).itemsize
    per_row_bytes = _LANE * (4 + n_mfs * out_bytes)   # x read + y write per row

    # ~4 MiB of streamed data per block; double-buffered this is ~8-9 MiB of
    # VMEM, safe under the default scoped limit on v5e/v6e/v7x.
    rows = max(_SUB, (target_block_bytes // per_row_bytes) // _SUB * _SUB)
    if rows >= rows_total:
        rows = rows_total
        # Megacore: only split into >=2 grid steps if each half still carries
        # >= ~1 MiB of work (otherwise the extra step is pure overhead).
        if rows_total * per_row_bytes >= (2 << 20):
            rows = pl.cdiv(pl.cdiv(rows_total, 2), _SUB) * _SUB
    grid = (pl.cdiv(rows_total, rows),)               # ragged last block is OK

    params = jnp.stack([mu, scale], axis=0)           # (2, n_mfs) f32 -> SMEM

    y3 = pl.pallas_call(
        _fuzzify_kernel,
        out_shape=jax.ShapeDtypeStruct((n_mfs, rows_total, _LANE), out_dtype),
        grid_spec=pltpu.PrefetchScalarGridSpec(
            num_scalar_prefetch=0,
            grid=grid,
            in_specs=[
                # whole (2, n_mfs) parameter array lives in SMEM (grid-invariant)
                pl.BlockSpec(memory_space=pltpu.MemorySpace.SMEM),
                pl.BlockSpec((rows, _LANE), lambda i: (i, 0)),       # x rows
            ],
            out_specs=pl.BlockSpec((n_mfs, rows, _LANE), lambda i: (0, i, 0)),
        ),
        compiler_params=pltpu.CompilerParams(
            dimension_semantics=("parallel",),
        ),
    )(params, x2)

    return y3.reshape(n_mfs, n_pad), n_pad            # contiguous reshape: free


def fuzzify_variable(x, mu, sigma, padding=0, *, out_dtype=jnp.float32,
                     transposed=False, min_pallas_cases=4096,
                     target_block_bytes=4 << 20):
    """Pallas implementation of FuzzifyVariable.forward (Gaussian MFs).

    x:       (n_cases, 1) or (n_cases,) float
    mu:      (n_mfs,) Gaussian centers
    sigma:   (n_mfs,) Gaussian widths
    padding: number of extra zero MF columns (pad_to semantics)
    transposed=False -> (n_cases, n_mfs + padding)   (module layout)
    transposed=True  -> (n_mfs + padding, n_cases)   (lane-dense; preferred for
                        fusing the transpose into the downstream rule-product)
    out_dtype: f32 default (module semantics); bf16 halves write bytes on
               v5e/v6e when the consumer accepts it (compute stays f32).
    """
    x_flat = jnp.asarray(x, jnp.float32).reshape(-1)
    n_cases = x_flat.shape[0]
    mu = jnp.asarray(mu, jnp.float32).reshape(-1)
    sigma = jnp.asarray(sigma, jnp.float32).reshape(-1)
    n_mfs = mu.shape[0]

    # Precompute -0.5 / sigma^2 once (n_mfs scalars) — keeps the divide off the
    # in-kernel EUP slot.  (sigma == 0 gives NaN at d == 0, same as the
    # module's own divide-by-zero; clamp upstream if parameters are learned.)
    scale = -0.5 / (sigma * sigma)

    if n_cases < min_pallas_cases:
        # Small-batch bypass: the pallas_call fixed cost dominates tiny ANFIS
        # batches; a fused XLA expression is faster there.
        d = x_flat[None, :] - mu[:, None]
        y_t = jnp.exp((d * d) * scale[:, None]).astype(out_dtype)
        n_pad = n_cases
    else:
        y_t, n_pad = _fuzzify_pallas_transposed(
            x_flat, mu, scale, out_dtype, target_block_bytes)

    if transposed:
        # Lane-dense layout, no transpose pass.  Slice is a no-op when
        # n_cases is already a multiple of 1024.
        y_t = y_t[:, :n_cases] if n_pad != n_cases else y_t
        if padding > 0:
            y_t = jnp.pad(y_t, ((0, padding), (0, 0)))
        return y_t

    # Module layout: ONE fused slice + transpose + pad pass (the (n_cases,
    # n_mfs+padding) buffer is materialized exactly once).
    y = y_t[:, :n_cases].T
    if padding > 0:
        y = jnp.pad(y, ((0, 0), (0, padding)))
    return y


def _reference(x_flat, mu, sigma, padding):
    # Pure-JAX reference mirroring the PyTorch module (Gaussian MFs + pad_to).
    d = x_flat[:, None] - mu[None, :]
    y = jnp.exp(-(d * d) / (2.0 * sigma[None, :] ** 2))
    if padding > 0:
        y = jnp.concatenate(
            [y, jnp.zeros((x_flat.shape[0], padding), dtype=y.dtype)], axis=1)
    return y


if __name__ == "__main__":
    key = jax.random.PRNGKey(0)

    n_mfs = 5          # five Gaussian membership functions
    padding = 3        # pad_to(8) -> 3 zero columns

    # Deterministic MF parameters (what the module __init__ would hold).
    mu = jnp.linspace(-2.0, 2.0, n_mfs, dtype=jnp.float32)
    sigma = jnp.full((n_mfs,), 0.75, dtype=jnp.float32) + 0.05 * jnp.arange(
        n_mfs, dtype=jnp.float32)

    # --- Pallas path: small but above the forced threshold; not a multiple of
    #     128/1024 so the ragged/pad handling is exercised. ---
    n_cases = 2000
    x = jax.random.normal(key, (n_cases, 1), dtype=jnp.float32) * 2.0
    y_ref = _reference(x.reshape(-1), mu, sigma, padding)

    y = fuzzify_variable(x, mu, sigma, padding, min_pallas_cases=1024)
    y = jax.block_until_ready(y)
    assert y.shape == (n_cases, n_mfs + padding), y.shape
    assert jnp.allclose(y, y_ref, atol=1e-5, rtol=1e-5), "module-layout mismatch"

    # Transposed (fusion-friendly) layout from the same kernel.
    y_t = jax.block_until_ready(
        fuzzify_variable(x, mu, sigma, padding, transposed=True,
                         min_pallas_cases=1024))
    assert y_t.shape == (n_mfs + padding, n_cases), y_t.shape
    assert jnp.allclose(y_t, y_ref.T, atol=1e-5, rtol=1e-5), "transposed mismatch"

    # --- Tiny batch -> jnp bypass (pallas fixed cost would dominate). ---
    x_small = jax.random.normal(key, (37, 1), dtype=jnp.float32)
    y_small = jax.block_until_ready(fuzzify_variable(x_small, mu, sigma, padding))
    y_small_ref = _reference(x_small.reshape(-1), mu, sigma, padding)
    assert y_small.shape == (37, n_mfs + padding)
    assert jnp.allclose(y_small, y_small_ref, atol=1e-5, rtol=1e-5)

    # TODO(synk): the module supports arbitrary MF callables in mfdefs; only
    # the standard ANFIS Gaussian MF is implemented here.
    print("KERNEL_OK")
</pallas_src>

<mosaic_0001>
module attributes {stable_mosaic.version = 11 : i64} {
  func.func @_fuzzify_kernel(%arg0: i32, %arg1: memref<2x5xf32, #tpu.memory_space<smem>>, %arg2: memref<16x128xf32, #tpu.memory_space<vmem>>, %arg3: memref<5x16x128xf32, #tpu.memory_space<vmem>>) attributes {dimension_semantics = [#tpu.dimension_semantics<parallel>], iteration_bounds = array<i64: 1>, scalar_prefetch = 0 : i64, scratch_operands = 0 : i64, tpu.core_type = #tpu.core_type<tc>, window_params = [{transform_indices = @transform_0, window_bounds = array<i64: 2, 5>}, {transform_indices = @transform_1, window_bounds = array<i64: 16, 128>}, {transform_indices = @transform_2, window_bounds = array<i64: 5, 16, 128>}]} {
    %c0 = arith.constant 0 : index
    %c0_0 = arith.constant 0 : index
    %0 = vector.load %arg2[%c0, %c0_0] : memref<16x128xf32, #tpu.memory_space<vmem>>, vector<16x128xf32>
    %c0_1 = arith.constant 0 : index
    %c0_2 = arith.constant 0 : index
    %1 = memref.load %arg1[%c0_1, %c0_2] : memref<2x5xf32, #tpu.memory_space<smem>>
    %2 = vector.broadcast %1 : f32 to vector<16x128xf32>
    %3 = arith.subf %0, %2 : vector<16x128xf32>
    %4 = arith.mulf %3, %3 : vector<16x128xf32>
    %c1 = arith.constant 1 : index
    %c0_3 = arith.constant 0 : index
    %5 = memref.load %arg1[%c1, %c0_3] : memref<2x5xf32, #tpu.memory_space<smem>>
    %6 = vector.broadcast %5 : f32 to vector<16x128xf32>
    %7 = arith.mulf %4, %6 : vector<16x128xf32>
    %8 = math.exp %7 : vector<16x128xf32>
    %c0_4 = arith.constant 0 : index
    %c0_5 = arith.constant 0 : index
    %c0_6 = arith.constant 0 : index
    %9 = vector.load %arg3[%c0_4, %c0_5, %c0_6] : memref<5x16x128xf32, #tpu.memory_space<vmem>>, vector<1x16x128xf32>
    %10 = vector.shape_cast %9 : vector<1x16x128xf32> to vector<16x128xf32>
    %11 = vector.shape_cast %8 : vector<16x128xf32> to vector<1x16x128xf32>
    tpu.vector_store %arg3[%c0_4, %c0_5, %c0_6], %11 {strides = array<i32>} : memref<5x16x128xf32, #tpu.memory_space<vmem>>, vector<1x16x128xf32>,
    %c0_7 = arith.constant 0 : index
    %c1_8 = arith.constant 1 : index
    %12 = memref.load %arg1[%c0_7, %c1_8] : memref<2x5xf32, #tpu.memory_space<smem>>
    %13 = vector.broadcast %12 : f32 to vector<16x128xf32>
    %14 = arith.subf %0, %13 : vector<16x128xf32>
    %15 = arith.mulf %14, %14 : vector<16x128xf32>
    %c1_9 = arith.constant 1 : index
    %c1_10 = arith.constant 1 : index
    %16 = memref.load %arg1[%c1_9, %c1_10] : memref<2x5xf32, #tpu.memory_space<smem>>
    %17 = vector.broadcast %16 : f32 to vector<16x128xf32>
    %18 = arith.mulf %15, %17 : vector<16x128xf32>
    %19 = math.exp %18 : vector<16x128xf32>
    %c1_11 = arith.constant 1 : index
    %c0_12 = arith.constant 0 : index
    %c0_13 = arith.constant 0 : index
    %20 = vector.load %arg3[%c1_11, %c0_12, %c0_13] : memref<5x16x128xf32, #tpu.memory_space<vmem>>, vector<1x16x128xf32>
    %21 = vector.shape_cast %20 : vector<1x16x128xf32> to vector<16x128xf32>
    %22 = vector.shape_cast %19 : vector<16x128xf32> to vector<1x16x128xf32>
    tpu.vector_store %arg3[%c1_11, %c0_12, %c0_13], %22 {strides = array<i32>} : memref<5x16x128xf32, #tpu.memory_space<vmem>>, vector<1x16x128xf32>,
    %c0_14 = arith.constant 0 : index
    %c2 = arith.constant 2 : index
    %23 = memref.load %arg1[%c0_14, %c2] : memref<2x5xf32, #tpu.memory_space<smem>>
    %24 = vector.broadcast %23 : f32 to vector<16x128xf32>
    %25 = arith.subf %0, %24 : vector<16x128xf32>
    %26 = arith.mulf %25, %25 : vector<16x128xf32>
    %c1_15 = arith.constant 1 : index
    %c2_16 = arith.constant 2 : index
    %27 = memref.load %arg1[%c1_15, %c2_16] : memref<2x5xf32, #tpu.memory_space<smem>>
    %28 = vector.broadcast %27 : f32 to vector<16x128xf32>
    %29 = arith.mulf %26, %28 : vector<16x128xf32>
    %30 = math.exp %29 : vector<16x128xf32>
    %c2_17 = arith.constant 2 : index
    %c0_18 = arith.constant 0 : index
    %c0_19 = arith.constant 0 : index
    %31 = vector.load %arg3[%c2_17, %c0_18, %c0_19] : memref<5x16x128xf32, #tpu.memory_space<vmem>>, vector<1x16x128xf32>
    %32 = vector.shape_cast %31 : vector<1x16x128xf32> to vector<16x128xf32>
    %33 = vector.shape_cast %30 : vector<16x128xf32> to vector<1x16x128xf32>
    tpu.vector_store %arg3[%c2_17, %c0_18, %c0_19], %33 {strides = array<i32>} : memref<5x16x128xf32, #tpu.memory_space<vmem>>, vector<1x16x128xf32>,
    %c0_20 = arith.constant 0 : index
    %c3 = arith.constant 3 : index
    %34 = memref.load %arg1[%c0_20, %c3] : memref<2x5xf32, #tpu.memory_space<smem>>
    %35 = vector.broadcast %34 : f32 to vector<16x128xf32>
    %36 = arith.subf %0, %35 : vector<16x128xf32>
    %37 = arith.mulf %36, %36 : vector<16x128xf32>
    %c1_21 = arith.constant 1 : index
    %c3_22 = arith.constant 3 : index
    %38 = memref.load %arg1[%c1_21, %c3_22] : memref<2x5xf32, #tpu.memory_space<smem>>
    %39 = vector.broadcast %38 : f32 to vector<16x128xf32>
    %40 = arith.mulf %37, %39 : vector<16x128xf32>
    %41 = math.exp %40 : vector<16x128xf32>
    %c3_23 = arith.constant 3 : index
    %c0_24 = arith.constant 0 : index
    %c0_25 = arith.constant 0 : index
    %42 = vector.load %arg3[%c3_23, %c0_24, %c0_25] : memref<5x16x128xf32, #tpu.memory_space<vmem>>, vector<1x16x128xf32>
    %43 = vector.shape_cast %42 : vector<1x16x128xf32> to vector<16x128xf32>
    %44 = vector.shape_cast %41 : vector<16x128xf32> to vector<1x16x128xf32>
    tpu.vector_store %arg3[%c3_23, %c0_24, %c0_25], %44 {strides = array<i32>} : memref<5x16x128xf32, #tpu.memory_space<vmem>>, vector<1x16x128xf32>,
    %c0_26 = arith.constant 0 : index
    %c4 = arith.constant 4 : index
    %45 = memref.load %arg1[%c0_26, %c4] : memref<2x5xf32, #tpu.memory_space<smem>>
    %46 = vector.broadcast %45 : f32 to vector<16x128xf32>
    %47 = arith.subf %0, %46 : vector<16x128xf32>
    %48 = arith.mulf %47, %47 : vector<16x128xf32>
    %c1_27 = arith.constant 1 : index
    %c4_28 = arith.constant 4 : index
    %49 = memref.load %arg1[%c1_27, %c4_28] : memref<2x5xf32, #tpu.memory_space<smem>>
    %50 = vector.broadcast %49 : f32 to vector<16x128xf32>
    %51 = arith.mulf %48, %50 : vector<16x128xf32>
    %52 = math.exp %51 : vector<16x128xf32>
    %c4_29 = arith.constant 4 : index
    %c0_30 = arith.constant 0 : index
    %c0_31 = arith.constant 0 : index
    %53 = vector.load %arg3[%c4_29, %c0_30, %c0_31] : memref<5x16x128xf32, #tpu.memory_space<vmem>>, vector<1x16x128xf32>
    %54 = vector.shape_cast %53 : vector<1x16x128xf32> to vector<16x128xf32>
    %55 = vector.shape_cast %52 : vector<16x128xf32> to vector<1x16x128xf32>
    tpu.vector_store %arg3[%c4_29, %c0_30, %c0_31], %55 {strides = array<i32>} : memref<5x16x128xf32, #tpu.memory_space<vmem>>, vector<1x16x128xf32>,
    return
  }
  func.func @transform_0(%arg0: i32) -> (i32, i32) {
    %c0_i32 = arith.constant 0 : i32
    %c0_i32_0 = arith.constant 0 : i32
    %c0_i32_1 = arith.constant 0 : i32
    return %c0_i32, %c0_i32_0 : i32, i32
  }
  func.func @transform_1(%arg0: i32) -> (i32, i32) {
    %c0_i32 = arith.constant 0 : i32
    %c0_i32_0 = arith.constant 0 : i32
    return %arg0, %c0_i32 : i32, i32
  }
  func.func @transform_2(%arg0: i32) -> (i32, i32, i32) {
    %c0_i32 = arith.constant 0 : i32
    %c0_i32_0 = arith.constant 0 : i32
    %c0_i32_1 = arith.constant 0 : i32
    return %c0_i32, %arg0, %c0_i32_0 : i32, i32, i32
  }
}

</mosaic_0001>

<bundles_post_ra>
// kernel: tpu_custom_call.1
= control target key start
LH: loop header
LB: loop body
LE: loop exit
PB: predicated region body
PF: predicated region fallthrough
CT: control target
= control target key end

     0   :  { %7 = vsyncpa [#allocation5], 0  ;;  %s315_s0 = inlined_call_operand.hbm [shape: f32[2,5], index: 0, kind: input, shape index: {}]   ;;  %s316_s1 = inlined_call_operand.hbm [shape: f32[16,128], index: 1, kind: input, shape index: {}]   ;;  %s317_s2 = inlined_call_operand.hbm [shape: f32[5,16,128], index: 2, kind: output, shape index: {}]  }
   0x1   :  { %8 = vsyncpa [#allocation3], 0 }
   0x2   :  { %9 = vsyncpa [#allocation4], 0  ;;  %s175_s11 = scalar_lea.hbm %s315_s0, 32 }
   0x3   :  { %p176_p0 = scmp.ne.s32.totalorder %s315_s0, %s175_s11  ;;  %p179_p1 = scmp.lt.u32.totalorder %s175_s11, %s315_s0 }
   0x5   :  { %p181_p2 = pnand %p179_p1, %p176_p0 }
   0x7   :  { %184 = shalt.err (!%p181_p2)
}
   0x8   :  { %s235_s16 = smov [#allocation2]   ;;  %s236_s19 = smov [#allocation6]  }
   0x9   :  { %17 = dma.hbm_to_smem %s315_s0, 32, %s235_s16, [#allocation5]  }
   0xa   :  { %s23_s20 = sshll.u32 %s236_s19, 4  ;;  %s185_s23 = scalar_lea.hbm %s316_s1, 256  ;;  %s24_s20 = int_to_ptr.vmem [resolvable:$true] %s23_s20 }
   0xb   :  { %p186_p3 = scmp.ne.s32.totalorder %s316_s1, %s185_s23  ;;  %p189_p4 = scmp.lt.u32.totalorder %s185_s23, %s316_s1 }
   0xd   :  { %p191_p5 = pnand %p189_p4, %p186_p3 }
   0xf   :  { %194 = shalt.err (!%p191_p5)
}
  0x10   :  { %s195_s28 = scalar_lea.vmem %s24_s20, 256  ;;  %p200_p7 = scmp.lt.s32.totalorder %s24_s20, %s24_s20 }
  0x11   :  { %p196_p6 = scmp.ne.s32.totalorder %s24_s20, %s195_s28  ;;  %p201_p8 = scmp.lt.s32.totalorder %s195_s28, %s195_s28 }
  0x13   :  { %p202_p9 = por %p201_p8, %p200_p7 }
  0x15   :  { %p203_p10 = pnand %p202_p9, %p196_p6 }
  0x17   :  { %206 = shalt.err (!%p203_p10)
}
  0x18   :  { %s237_s0 = smov 128   ;;  %s238_s29 = smov 8  }
  0x19   :  { %29 = dma.hbm_to_vmem [thread:$0]  %s316_s1, 256, %s24_s20, [#allocation3], %s237_s0, %s237_s0, %s238_s29  }
  0x1a   :  { %229 = dma.done.wait [#allocation5], 32  }
  0x1b   :  { %230 = vsyncadd [#allocation5], 4294967264 }
  0x1c   :  { %231 = dma.done.wait [#allocation3], 256  }
  0x1d   :  { %232 = vsyncadd [#allocation3], 4294967040 }
  0x1e   :  { %36 = sfence }
  0x1f   :  { %s39_s4 = sld [smem:[#allocation2]]  ;;  %s142_s6 = sld [smem:[#allocation2 + $0x1]]  ;;  %v37_v0 = vld [vmem:[#allocation6] sm:$0xff]  ;;  %v38_v1 = vld [vmem:[#allocation6 + $0x8] sm:$0xff] }
  0x20   :  { %s141_s5 = sld [smem:[#allocation2 + $0x80]]  ;;  %s282_s7 = sld [smem:[#allocation2 + $0x81]] }
  0x21   :  { %s144_s8 = sld [smem:[#allocation2 + $0x2]]  ;;  %s286_s10 = sld [smem:[#allocation2 + $0x3]] }
  0x22   :  { %s284_s9 = sld [smem:[#allocation2 + $0x82]]  ;;  %s288_s11 = sld [smem:[#allocation2 + $0x83]] }
  0x23   :  { %s291_s1 = sld [smem:[#allocation2 + $0x4]]  ;;  %s239_s13 = smov [#allocation7]  }
  0x24   :  { %s294_s12 = sld [smem:[#allocation2 + $0x84]]  ;;  %s128_s14 = sshll.u32 %s239_s13, 4  ;;  %s129_s14 = int_to_ptr.vmem [resolvable:$true] %s128_s14 }
  0x25   :  { %v40_v2 = vstv %s39_s4  ;;  %v56_v6 = vstv %s142_s6  ;;  %s207_s15 = scalar_lea.vmem %s129_s14, 1280  ;;  %p212_p12 = scmp.lt.s32.totalorder %s129_s14, %s129_s14 }
  0x26   :  { %v46_v3 = vstv %s141_s5  ;;  %v41_v4 = vsub.f32 %v37_v0, %v40_v2  ;;  %v42_v5 = vsub.f32 %v38_v1, %v40_v2  ;;  %v62_v7 = vstv %s282_s7  ;;  %p208_p11 = scmp.ne.s32.totalorder %s129_s14, %s207_s15  ;;  %p213_p13 = scmp.lt.s32.totalorder %s207_s15, %s207_s15 }
  0x27   :  { %v57_v8 = vsub.f32 %v37_v0, %v56_v6  ;;  %v58_v9 = vsub.f32 %v38_v1, %v56_v6  ;;  %v73_v10 = vstv %s144_s8  ;;  %v90_v18 = vstv %s286_s10 }
  0x28   :  { %v79_v11 = vstv %s284_s9  ;;  %v43_v12 = vmul.f32 %v41_v4, %v41_v4  ;;  %v44_v13 = vmul.f32 %v42_v5, %v42_v5  ;;  %v74_v14 = vsub.f32 %v37_v0, %v73_v10  ;;  %p214_p0 = por %p213_p13, %p212_p12 }
  0x29   :  { %v75_v15 = vsub.f32 %v38_v1, %v73_v10  ;;  %v59_v16 = vmul.f32 %v57_v8, %v57_v8  ;;  %v60_v17 = vmul.f32 %v58_v9, %v58_v9  ;;  %v96_v19 = vstv %s288_s11 }
  0x2a   :  { %v47_v20 = vmul.f32 %v46_v3, %v43_v12  ;;  %v48_v21 = vmul.f32 %v46_v3, %v44_v13  ;;  %v76_v22 = vmul.f32 %v74_v14, %v74_v14  ;;  %v91_v26 = vsub.f32 %v37_v0, %v90_v18  ;;  %p215_p1 = pnand %p214_p0, %p208_p11 }
  0x2b   :  { %v77_v23 = vmul.f32 %v75_v15, %v75_v15  ;;  %v63_v24 = vmul.f32 %v62_v7, %v59_v16  ;;  %v64_v25 = vmul.f32 %v62_v7, %v60_v17  ;;  %v92_v27 = vsub.f32 %v38_v1, %v90_v18 }
  0x2c   :  { %v49_v28 = vmul.f32 1.442695, %v47_v20  ;;  %v51_v29 = vmul.f32 1.442695, %v48_v21  ;;  %v80_v30 = vmul.f32 %v79_v11, %v76_v22  ;;  %v93_v34 = vmul.f32 %v91_v26, %v91_v26 }
  0x2d   :  { %v81_v31 = vmul.f32 %v79_v11, %v77_v23  ;;  %v65_v32 = vmul.f32 1.442695, %v63_v24  ;;  %v67_v33 = vmul.f32 1.442695, %v64_v25  ;;  %v94_v35 = vmul.f32 %v92_v27, %v92_v27 }
  0x2e   :  { %155 = vpow2.f32 %v49_v28  ;;  %v82_v36 = vmul.f32 1.442695, %v80_v30  ;;  %v107_v38 = vstv %s291_s1  ;;  %v97_v39 = vmul.f32 %v96_v19, %v93_v34 }
  0x2f   :  { %v84_v37 = vmul.f32 1.442695, %v81_v31  ;;  %157 = vpow2.f32 %v51_v29  ;;  %v98_v40 = vmul.f32 %v96_v19, %v94_v35  ;;  %v108_v41 = vsub.f32 %v37_v0, %v107_v38 }
  0x30   :  { %159 = vpow2.f32 %v65_v32  ;;  %v113_v42 = vstv %s294_s12  ;;  %v109_v43 = vsub.f32 %v38_v1, %v107_v38  ;;  %v99_v44 = vmul.f32 1.442695, %v97_v39 }
  0x31   :  { %161 = vpow2.f32 %v67_v33  ;;  %v101_v45 = vmul.f32 1.442695, %v98_v40  ;;  %v110_v46 = vmul.f32 %v108_v41, %v108_v41 }
  0x32   :  { %163 = vpow2.f32 %v82_v36  ;;  %v111_v47 = vmul.f32 %v109_v43, %v109_v43 }
  0x33   :  { %165 = vpow2.f32 %v84_v37  ;;  %v114_v48 = vmul.f32 %v113_v42, %v110_v46 }
  0x34   :  { %167 = vpow2.f32 %v99_v44  ;;  %v115_v49 = vmul.f32 %v113_v42, %v111_v47 }
  0x35   :  { %169 = vpow2.f32 %v101_v45  ;;  %v116_v50 = vmul.f32 1.442695, %v114_v48 }
  0x36   :  { %v118_v51 = vmul.f32 1.442695, %v115_v49 }
  0x37   :  { %171 = vpow2.f32 %v116_v50 }
  0x38   :  { %v156_v52 = vpop.eup %155  ;;  %173 = vpow2.f32 %v118_v51 }
  0x39   :  { %v158_v53 = vpop.eup %157  ;;  %53 = vst [vmem:[#allocation7] sm:$0xff] %v156_v52 }
  0x3a   :  { %v160_v54 = vpop.eup %159  ;;  %54 = vst [vmem:[#allocation7 + $0x8] sm:$0xff] %v158_v53 }
  0x3b   :  { %v162_v55 = vpop.eup %161  ;;  %70 = vst [vmem:[#allocation7 + $0x10] sm:$0xff] %v160_v54 }
  0x3c   :  { %v164_v56 = vpop.eup %163  ;;  %71 = vst [vmem:[#allocation7 + $0x18] sm:$0xff] %v162_v55 }
  0x3d   :  { %v166_v57 = vpop.eup %165  ;;  %87 = vst [vmem:[#allocation7 + $0x20] sm:$0xff] %v164_v56 }
  0x3e   :  { %v168_v58 = vpop.eup %167  ;;  %88 = vst [vmem:[#allocation7 + $0x28] sm:$0xff] %v166_v57 }
  0x3f   :  { %v170_v59 = vpop.eup %169  ;;  %104 = vst [vmem:[#allocation7 + $0x30] sm:$0xff] %v168_v58 }
  0x40   :  { %105 = vst [vmem:[#allocation7 + $0x38] sm:$0xff] %v170_v59 }
  0x41   :  { %v172_v60 = vpop.eup %171 }
  0x42   :  { %v174_v61 = vpop.eup %173  ;;  %121 = vst [vmem:[#allocation7 + $0x40] sm:$0xff] %v172_v60 }
  0x43   :  { %122 = vst [vmem:[#allocation7 + $0x48] sm:$0xff] %v174_v61 }
  0x44   :  { %218 = shalt.err (!%p215_p1)
}
  0x45   :  { %s219_s18 = scalar_lea.hbm %s317_s2, 1280 }
  0x46   :  { %p220_p2 = scmp.ne.s32.totalorder %s317_s2, %s219_s18  ;;  %p223_p3 = scmp.lt.u32.totalorder %s219_s18, %s317_s2 }
  0x48   :  { %p225_p4 = pnand %p223_p3, %p220_p2 }
  0x4a   :  { %228 = shalt.err (!%p225_p4)
}
  0x4b   :  { %134 = dma.vmem_to_hbm [thread:$0]  %s129_s14, 1280, %s317_s2, [#allocation4], %s237_s0, %s237_s0, %s238_s29  }
  0x4c   :  { %233 = dma.done.wait [#allocation4], 1280  }
  0x4d   :  { %234 = vsyncadd [#allocation4], 4294966016 }
  0x4e   :  { %138 = vsyncpa [#allocation3], 1 }
  0x4f   :  { %139 = vsyncpa [#allocation4], 1 }
  0x50   :  { %140 = vsyncpa [#allocation5], 1 }

</bundles_post_ra>
